<compile_context>
chip_gen: v7x
topology: tpu7x:2x2x1
jax: 0.10.0
libtpu: 0.0.40
codegen_flags: <defaults>
</compile_context>

<pallas_src>
import functools

import jax
import jax.numpy as jnp
from jax import lax
from jax.experimental import pallas as pl
from jax.experimental.pallas import tpu as pltpu


# Polynomial coefficients of f_real, ordered u^0 .. u^6.
_F_COEFFS = (
    0.4623734302522332,       # u^0
    1.5733140772285443,       # u^1
    0.06594985868545625,      # u^2
    -0.8676433255901695,      # u^3
    0.23570323139025814,      # u^4
    -0.005876625881704264,    # u^5
    5.1464175544821254e-05,   # u^6
)


def _f_real_estrin(u):
    """f_real(u) via Estrin's scheme: ~7-op critical path, exposes VALU ILP."""
    c0, c1, c2, c3, c4, c5, c6 = (jnp.float32(c) for c in _F_COEFFS)
    u2 = u * u
    u4 = u2 * u2
    p01 = c0 + c1 * u
    p23 = c2 + c3 * u
    p45 = c4 + c5 * u
    return p01 + u2 * p23 + u4 * (p45 + u2 * c6)


def _rollout_kernel(init_ref, traj_ref, u_ref, *, T, N, seg_pad, a_half, b_half):
    """One grid step == T time steps of the finite-volume scheme.

    init_ref : (bb, n_lanes)     packed initial condition for this batch block
    traj_ref : (T, bb, n_lanes)  output block for this time chunk
    u_ref    : (bb, n_lanes)     VMEM scratch carrying the state across chunks
    """
    c = pl.program_id(1)  # time-chunk index (innermost, sequential)

    @pl.when(c == 0)
    def _():
        u_ref[...] = init_ref[...].astype(u_ref.dtype)

    n_lanes = u_ref.shape[-1]
    # (1, n_lanes) masks, hoisted out of the time loop; per-segment cell index.
    lane = lax.broadcasted_iota(jnp.int32, (1, n_lanes), 1)
    k = lane % seg_pad
    is_left = k == 0
    is_right = k == (N - 1)
    ah = jnp.float32(a_half)   # 0.5 * dt / dx
    bh = jnp.float32(b_half)   # 0.5 * dt * M / dx

    def advance(u):
        # fh[k] = (dt/dx)*f_half[k] = g[k] + h[k+1] with
        #   g = ah*f + bh*u,  h = ah*f - bh*u   (single neighbour roll).
        f = _f_real_estrin(u)
        g = ah * f + bh * u
        h = ah * f - bh * u
        fh = g + pltpu.roll(h, shift=n_lanes - 1, axis=1)   # h[:, k+1]
        fh_m1 = pltpu.roll(fh, shift=1, axis=1)             # fh[:, k-1]
        v = u - (fh - fh_m1)                                 # interior update
        # Boundary copies of the freshly updated neighbours:
        #   u_new[:, 0] = u_new[:, 1],  u_new[:, N-1] = u_new[:, N-2]
        # Segment-edge lanes touched by wrap-around rolls are exactly the lanes
        # overwritten here (or dead padding), so the packed stencil is exact.
        v_p1 = pltpu.roll(v, shift=n_lanes - 1, axis=1)
        v_m1 = pltpu.roll(v, shift=1, axis=1)
        v = jnp.where(is_left, v_p1, v)
        v = jnp.where(is_right, v_m1, v)
        return v

    def body(t, u):
        # trajectories[c*T + t] = current state; then advance one step.
        traj_ref[t] = u.astype(traj_ref.dtype)
        return advance(u)

    # Note: the very last advance of the rollout (and any tail-padding steps in
    # the final chunk) are wasted work; negligible vs stepnum, kept for simplicity.
    u_last = lax.fori_loop(0, T, body, u_ref[...], unroll=min(T, 8))

    if seg_pad != N:
        # Keep dead padding lanes from drifting over long rollouts.
        u_last = jnp.where(k < N, u_last, jnp.float32(0.0))
    u_ref[...] = u_last


def variant_coe_linear1d_predict(init, stepnum, *, dt, dx, M):
    """Equivalent of VariantCoeLinear1dPredict.forward(init, stepnum)."""
    B, N = init.shape
    out_dtype = init.dtype
    compute_dtype = jnp.float32
    init = init.astype(compute_dtype)

    # ---- packed lane layout -------------------------------------------------
    if N <= 128:
        seg_pad = 1
        while seg_pad < N:
            seg_pad *= 2                 # power of two -> divides 128
        segs_per_row = 128 // seg_pad
        n_lanes = 128
    else:
        seg_pad = ((N + 127) // 128) * 128
        segs_per_row = 1
        n_lanes = seg_pad

    rows = pl.cdiv(B, segs_per_row)
    rows_pad = ((rows + 7) // 8) * 8      # sublane-dense row count
    b_full = rows_pad * segs_per_row

    # (B, N) -> (b_full, seg_pad) -> (rows_pad, n_lanes)
    init_seg = jnp.zeros((b_full, seg_pad), compute_dtype).at[:B, :N].set(init)
    init_packed = init_seg.reshape(rows_pad, n_lanes)

    # ---- batch blocking: >=2 blocks (v7x megacore) when rows allow ----------
    bb = rows_pad // 2 if rows_pad % 16 == 0 else rows_pad

    # ---- time chunking: biggest T whose double-buffered output block fits ---
    budget_bytes = 8 * 1024 * 1024        # conservative: safe on v5e/v6e/v7x
    max_t = max(1, budget_bytes // (2 * bb * n_lanes * 4))
    T = min(stepnum, max_t)
    n_chunks = pl.cdiv(stepnum, T)
    steps_pad = n_chunks * T              # pad time, slice in the wrapper

    a_half = 0.5 * float(dt) / float(dx)
    b_half = 0.5 * float(dt) * float(M) / float(dx)

    kernel = functools.partial(_rollout_kernel, T=T, N=N, seg_pad=seg_pad,
                               a_half=a_half, b_half=b_half)

    traj_packed = pl.pallas_call(
        kernel,
        out_shape=jax.ShapeDtypeStruct((steps_pad, rows_pad, n_lanes), out_dtype),
        grid_spec=pltpu.PrefetchScalarGridSpec(
            num_scalar_prefetch=0,
            grid=(rows_pad // bb, n_chunks),
            in_specs=[pl.BlockSpec((bb, n_lanes), lambda b, c: (b, 0))],
            out_specs=pl.BlockSpec((T, bb, n_lanes), lambda b, c: (c, b, 0)),
            scratch_shapes=[pltpu.VMEM((bb, n_lanes), compute_dtype)],
        ),
        compiler_params=pltpu.CompilerParams(
            # batch blocks are independent; the time recurrence is sequential
            dimension_semantics=("parallel", "arbitrary"),
            vmem_limit_bytes=32 * 1024 * 1024,
        ),
    )(init_packed)

    # Unpack: (steps_pad, rows_pad, n_lanes) -> (stepnum, B, N)
    traj = traj_packed.reshape(steps_pad, b_full, seg_pad)[:stepnum, :B, :N]
    return traj


# ------------------------------ pure-JAX reference ---------------------------

def _f_real_reference(u):
    # Exact power form from the PyTorch module.
    return (1.5733140772285443 * u
            + -0.8676433255901695 * u ** 3
            + 0.4623734302522332
            + 0.23570323139025814 * u ** 4
            + 0.06594985868545625 * u ** 2
            + -0.005876625881704264 * u ** 5
            + 5.1464175544821254e-05 * u ** 6)


def _reference(init, stepnum, *, dt, dx, M):
    # Mirrors the PyTorch loop semantics.
    u = init
    traj = [u]
    for _ in range(1, stepnum):
        f = _f_real_reference(u)
        f_half = 0.5 * (f[:, :-1] + f[:, 1:]) - 0.5 * M * (u[:, 1:] - u[:, :-1])
        interior = u[:, 1:-1] - (dt / dx) * (f_half[:, 1:] - f_half[:, :-1])
        u = jnp.concatenate([interior[:, :1], interior, interior[:, -1:]], axis=1)
        traj.append(u)
    return jnp.stack(traj, axis=0)


if __name__ == "__main__":
    # Small, module-consistent shapes: batch_size=4, N=16 spatial cells,
    # stepnum=8 time steps.
    batch_size, N, stepnum = 4, 16, 8
    X = 2.0
    dx = X / N          # module registers dx as a buffer
    dt = 0.01           # module registers dt as a buffer
    M = 1.6             # Lax-Friedrichs dissipation coefficient (max_f_prime)

    key = jax.random.PRNGKey(0)
    # Deterministic smooth-ish initial condition u0, shape (batch_size, N).
    u0 = 0.5 + 0.25 * jax.random.uniform(key, (batch_size, N), dtype=jnp.float32)

    traj = variant_coe_linear1d_predict(u0, stepnum, dt=dt, dx=dx, M=M)
    traj = jax.block_until_ready(traj)

    ref = _reference(u0, stepnum, dt=dt, dx=dx, M=M)
    assert traj.shape == (stepnum, batch_size, N)
    assert jnp.allclose(traj, ref, rtol=1e-4, atol=1e-5)

    print("KERNEL_OK")
</pallas_src>

<mosaic_0001>
module attributes {stable_mosaic.version = 11 : i64} {
  func.func @_rollout_kernel(%arg0: i32, %arg1: i32, %arg2: memref<8x128xf32, #tpu.memory_space<vmem>>, %arg3: memref<8x8x128xf32, #tpu.memory_space<vmem>>, %arg4: memref<8x128xf32, #tpu.memory_space<vmem>>) attributes {dimension_semantics = [#tpu.dimension_semantics<parallel>, #tpu.dimension_semantics<arbitrary>], iteration_bounds = array<i64: 1, 1>, scalar_prefetch = 0 : i64, scratch_operands = 1 : i64, tpu.core_type = #tpu.core_type<tc>, window_params = [{transform_indices = @transform_0, window_bounds = array<i64: 8, 128>}, {transform_indices = @transform_1, window_bounds = array<i64: 8, 8, 128>}]} {
    %c0_i32 = arith.constant 0 : i32
    %0 = arith.cmpi eq, %arg1, %c0_i32 : i32
    %1 = arith.extui %0 : i1 to i32
    %c0_i32_0 = arith.constant 0 : i32
    %2 = arith.cmpi ne, %1, %c0_i32_0 : i32
    scf.if %2 {
      %c0_115 = arith.constant 0 : index
      %c0_116 = arith.constant 0 : index
      %410 = vector.load %arg2[%c0_115, %c0_116] : memref<8x128xf32, #tpu.memory_space<vmem>>, vector<8x128xf32>
      %c0_117 = arith.constant 0 : index
      %c0_118 = arith.constant 0 : index
      %411 = vector.load %arg4[%c0_117, %c0_118] : memref<8x128xf32, #tpu.memory_space<vmem>>, vector<8x128xf32>
      tpu.vector_store %arg4[%c0_117, %c0_118], %410 {strides = array<i32>} : memref<8x128xf32, #tpu.memory_space<vmem>>, vector<8x128xf32>,
    } else {
    }
    %3 = tpu.iota {dimensions = array<i32: 1>} : vector<1x128xi32>
    %c16_i32 = arith.constant 16 : i32
    %c0_i32_1 = arith.constant 0 : i32
    %4 = arith.cmpi eq, %c16_i32, %c0_i32_1 : i32
    %c1_i32 = arith.constant 1 : i32
    %5 = arith.select %4, %c1_i32, %c16_i32 : i32
    %6 = vector.broadcast %5 : i32 to vector<1x128xi32>
    %7 = arith.remsi %3, %6 : vector<1x128xi32>
    %c0_i32_2 = arith.constant 0 : i32
    %8 = vector.broadcast %c0_i32_2 : i32 to vector<1x128xi32>
    %9 = arith.cmpi ne, %7, %8 : vector<1x128xi32>
    %c0_i32_3 = arith.constant 0 : i32
    %10 = vector.broadcast %c0_i32_3 : i32 to vector<1x128xi32>
    %11 = arith.cmpi slt, %7, %10 : vector<1x128xi32>
    %c0_i32_4 = arith.constant 0 : i32
    %12 = arith.cmpi slt, %5, %c0_i32_4 : i32
    %13 = vector.broadcast %12 : i1 to vector<1x128xi1>
    %14 = vector.broadcast %13 : vector<1x128xi1> to vector<1x128xi1>
    %15 = arith.xori %11, %14 : vector<1x128xi1>
    %16 = arith.andi %15, %9 : vector<1x128xi1>
    %17 = vector.broadcast %5 : i32 to vector<1x128xi32>
    %18 = arith.addi %7, %17 : vector<1x128xi32>
    %19 = arith.select %16, %18, %7 : vector<1x128xi1>, vector<1x128xi32>
    %c0_i32_5 = arith.constant 0 : i32
    %20 = vector.broadcast %c0_i32_5 : i32 to vector<1x128xi32>
    %21 = arith.cmpi eq, %19, %20 : vector<1x128xi32>
    %c15_i32 = arith.constant 15 : i32
    %22 = vector.broadcast %c15_i32 : i32 to vector<1x128xi32>
    %23 = arith.cmpi eq, %19, %22 : vector<1x128xi32>
    %c0 = arith.constant 0 : index
    %c0_6 = arith.constant 0 : index
    %24 = vector.load %arg4[%c0, %c0_6] : memref<8x128xf32, #tpu.memory_space<vmem>>, vector<8x128xf32>
    %cst = arith.constant 4.000000e-02 : f32
    %cst_7 = arith.constant 6.400000e-02 : f32
    %c0_i32_8 = arith.constant 0 : i32
    %25 = arith.index_cast %c0_i32_8 : i32 to index
    %c0_9 = arith.constant 0 : index
    %c0_10 = arith.constant 0 : index
    %26 = vector.load %arg3[%25, %c0_9, %c0_10] : memref<8x8x128xf32, #tpu.memory_space<vmem>>, vector<1x8x128xf32>
    %27 = vector.shape_cast %26 : vector<1x8x128xf32> to vector<8x128xf32>
    %28 = vector.shape_cast %24 : vector<8x128xf32> to vector<1x8x128xf32>
    tpu.vector_store %arg3[%25, %c0_9, %c0_10], %28 {strides = array<i32>} : memref<8x8x128xf32, #tpu.memory_space<vmem>>, vector<1x8x128xf32>,
    %29 = arith.mulf %24, %24 : vector<8x128xf32>
    %30 = arith.mulf %29, %29 : vector<8x128xf32>
    %cst_11 = arith.constant 1.57331407 : f32
    %31 = vector.broadcast %cst_11 : f32 to vector<8x128xf32>
    %32 = arith.mulf %31, %24 : vector<8x128xf32>
    %cst_12 = arith.constant 0.462373435 : f32
    %33 = vector.broadcast %cst_12 : f32 to vector<8x128xf32>
    %34 = arith.addf %33, %32 : vector<8x128xf32>
    %cst_13 = arith.constant -0.867643296 : f32
    %35 = vector.broadcast %cst_13 : f32 to vector<8x128xf32>
    %36 = arith.mulf %35, %24 : vector<8x128xf32>
    %cst_14 = arith.constant 0.0659498572 : f32
    %37 = vector.broadcast %cst_14 : f32 to vector<8x128xf32>
    %38 = arith.addf %37, %36 : vector<8x128xf32>
    %cst_15 = arith.constant -0.00587662589 : f32
    %39 = vector.broadcast %cst_15 : f32 to vector<8x128xf32>
    %40 = arith.mulf %39, %24 : vector<8x128xf32>
    %cst_16 = arith.constant 0.23570323 : f32
    %41 = vector.broadcast %cst_16 : f32 to vector<8x128xf32>
    %42 = arith.addf %41, %40 : vector<8x128xf32>
    %43 = arith.mulf %29, %38 : vector<8x128xf32>
    %44 = arith.addf %34, %43 : vector<8x128xf32>
    %cst_17 = arith.constant 5.14641761E-5 : f32
    %45 = vector.broadcast %cst_17 : f32 to vector<8x128xf32>
    %46 = arith.mulf %29, %45 : vector<8x128xf32>
    %47 = arith.addf %42, %46 : vector<8x128xf32>
    %48 = arith.mulf %30, %47 : vector<8x128xf32>
    %49 = arith.addf %44, %48 : vector<8x128xf32>
    %50 = vector.broadcast %cst : f32 to vector<8x128xf32>
    %51 = arith.mulf %50, %49 : vector<8x128xf32>
    %52 = vector.broadcast %cst_7 : f32 to vector<8x128xf32>
    %53 = arith.mulf %52, %24 : vector<8x128xf32>
    %54 = arith.addf %51, %53 : vector<8x128xf32>
    %55 = vector.broadcast %cst : f32 to vector<8x128xf32>
    %56 = arith.mulf %55, %49 : vector<8x128xf32>
    %57 = vector.broadcast %cst_7 : f32 to vector<8x128xf32>
    %58 = arith.mulf %57, %24 : vector<8x128xf32>
    %59 = arith.subf %56, %58 : vector<8x128xf32>
    %c127_i32 = arith.constant 127 : i32
    %60 = tpu.dynamic_rotate %59 by %c127_i32 dim 1 : vector<8x128xf32>, i32 -> vector<8x128xf32>
    %61 = arith.addf %54, %60 : vector<8x128xf32>
    %c1_i32_18 = arith.constant 1 : i32
    %62 = tpu.dynamic_rotate %61 by %c1_i32_18 dim 1 : vector<8x128xf32>, i32 -> vector<8x128xf32>
    %63 = arith.subf %61, %62 : vector<8x128xf32>
    %64 = arith.subf %24, %63 : vector<8x128xf32>
    %c127_i32_19 = arith.constant 127 : i32
    %65 = tpu.dynamic_rotate %64 by %c127_i32_19 dim 1 : vector<8x128xf32>, i32 -> vector<8x128xf32>
    %c1_i32_20 = arith.constant 1 : i32
    %66 = tpu.dynamic_rotate %64 by %c1_i32_20 dim 1 : vector<8x128xf32>, i32 -> vector<8x128xf32>
    %67 = vector.shape_cast %21 : vector<1x128xi1> to vector<1x128xi1>
    %68 = vector.broadcast %67 : vector<1x128xi1> to vector<8x128xi1>
    %69 = arith.select %68, %65, %64 : vector<8x128xi1>, vector<8x128xf32>
    %70 = vector.shape_cast %23 : vector<1x128xi1> to vector<1x128xi1>
    %71 = vector.broadcast %70 : vector<1x128xi1> to vector<8x128xi1>
    %72 = arith.select %71, %66, %69 : vector<8x128xi1>, vector<8x128xf32>
    %c1_i32_21 = arith.constant 1 : i32
    %73 = arith.index_cast %c1_i32_21 : i32 to index
    %c0_22 = arith.constant 0 : index
    %c0_23 = arith.constant 0 : index
    %74 = vector.load %arg3[%73, %c0_22, %c0_23] : memref<8x8x128xf32, #tpu.memory_space<vmem>>, vector<1x8x128xf32>
    %75 = vector.shape_cast %74 : vector<1x8x128xf32> to vector<8x128xf32>
    %76 = vector.shape_cast %72 : vector<8x128xf32> to vector<1x8x128xf32>
    tpu.vector_store %arg3[%73, %c0_22, %c0_23], %76 {strides = array<i32>} : memref<8x8x128xf32, #tpu.memory_space<vmem>>, vector<1x8x128xf32>,
    %77 = arith.mulf %72, %72 : vector<8x128xf32>
    %78 = arith.mulf %77, %77 : vector<8x128xf32>
    %cst_24 = arith.constant 1.57331407 : f32
    %79 = vector.broadcast %cst_24 : f32 to vector<8x128xf32>
    %80 = arith.mulf %79, %72 : vector<8x128xf32>
    %cst_25 = arith.constant 0.462373435 : f32
    %81 = vector.broadcast %cst_25 : f32 to vector<8x128xf32>
    %82 = arith.addf %81, %80 : vector<8x128xf32>
    %cst_26 = arith.constant -0.867643296 : f32
    %83 = vector.broadcast %cst_26 : f32 to vector<8x128xf32>
    %84 = arith.mulf %83, %72 : vector<8x128xf32>
    %cst_27 = arith.constant 0.0659498572 : f32
    %85 = vector.broadcast %cst_27 : f32 to vector<8x128xf32>
    %86 = arith.addf %85, %84 : vector<8x128xf32>
    %cst_28 = arith.constant -0.00587662589 : f32
    %87 = vector.broadcast %cst_28 : f32 to vector<8x128xf32>
    %88 = arith.mulf %87, %72 : vector<8x128xf32>
    %cst_29 = arith.constant 0.23570323 : f32
    %89 = vector.broadcast %cst_29 : f32 to vector<8x128xf32>
    %90 = arith.addf %89, %88 : vector<8x128xf32>
    %91 = arith.mulf %77, %86 : vector<8x128xf32>
    %92 = arith.addf %82, %91 : vector<8x128xf32>
    %cst_30 = arith.constant 5.14641761E-5 : f32
    %93 = vector.broadcast %cst_30 : f32 to vector<8x128xf32>
    %94 = arith.mulf %77, %93 : vector<8x128xf32>
    %95 = arith.addf %90, %94 : vector<8x128xf32>
    %96 = arith.mulf %78, %95 : vector<8x128xf32>
    %97 = arith.addf %92, %96 : vector<8x128xf32>
    %98 = vector.broadcast %cst : f32 to vector<8x128xf32>
    %99 = arith.mulf %98, %97 : vector<8x128xf32>
    %100 = vector.broadcast %cst_7 : f32 to vector<8x128xf32>
    %101 = arith.mulf %100, %72 : vector<8x128xf32>
    %102 = arith.addf %99, %101 : vector<8x128xf32>
    %103 = vector.broadcast %cst : f32 to vector<8x128xf32>
    %104 = arith.mulf %103, %97 : vector<8x128xf32>
    %105 = vector.broadcast %cst_7 : f32 to vector<8x128xf32>
    %106 = arith.mulf %105, %72 : vector<8x128xf32>
    %107 = arith.subf %104, %106 : vector<8x128xf32>
    %c127_i32_31 = arith.constant 127 : i32
    %108 = tpu.dynamic_rotate %107 by %c127_i32_31 dim 1 : vector<8x128xf32>, i32 -> vector<8x128xf32>
    %109 = arith.addf %102, %108 : vector<8x128xf32>
    %c1_i32_32 = arith.constant 1 : i32
    %110 = tpu.dynamic_rotate %109 by %c1_i32_32 dim 1 : vector<8x128xf32>, i32 -> vector<8x128xf32>
    %111 = arith.subf %109, %110 : vector<8x128xf32>
    %112 = arith.subf %72, %111 : vector<8x128xf32>
    %c127_i32_33 = arith.constant 127 : i32
    %113 = tpu.dynamic_rotate %112 by %c127_i32_33 dim 1 : vector<8x128xf32>, i32 -> vector<8x128xf32>
    %c1_i32_34 = arith.constant 1 : i32
    %114 = tpu.dynamic_rotate %112 by %c1_i32_34 dim 1 : vector<8x128xf32>, i32 -> vector<8x128xf32>
    %115 = vector.shape_cast %21 : vector<1x128xi1> to vector<1x128xi1>
    %116 = vector.broadcast %115 : vector<1x128xi1> to vector<8x128xi1>
    %117 = arith.select %116, %113, %112 : vector<8x128xi1>, vector<8x128xf32>
    %118 = vector.shape_cast %23 : vector<1x128xi1> to vector<1x128xi1>
    %119 = vector.broadcast %118 : vector<1x128xi1> to vector<8x128xi1>
    %120 = arith.select %119, %114, %117 : vector<8x128xi1>, vector<8x128xf32>
    %c2_i32 = arith.constant 2 : i32
    %121 = arith.index_cast %c2_i32 : i32 to index
    %c0_35 = arith.constant 0 : index
    %c0_36 = arith.constant 0 : index
    %122 = vector.load %arg3[%121, %c0_35, %c0_36] : memref<8x8x128xf32, #tpu.memory_space<vmem>>, vector<1x8x128xf32>
    %123 = vector.shape_cast %122 : vector<1x8x128xf32> to vector<8x128xf32>
    %124 = vector.shape_cast %120 : vector<8x128xf32> to vector<1x8x128xf32>
    tpu.vector_store %arg3[%121, %c0_35, %c0_36], %124 {strides = array<i32>} : memref<8x8x128xf32, #tpu.memory_space<vmem>>, vector<1x8x128xf32>,
    %125 = arith.mulf %120, %120 : vector<8x128xf32>
    %126 = arith.mulf %125, %125 : vector<8x128xf32>
    %cst_37 = arith.constant 1.57331407 : f32
    %127 = vector.broadcast %cst_37 : f32 to vector<8x128xf32>
    %128 = arith.mulf %127, %120 : vector<8x128xf32>
    %cst_38 = arith.constant 0.462373435 : f32
    %129 = vector.broadcast %cst_38 : f32 to vector<8x128xf32>
    %130 = arith.addf %129, %128 : vector<8x128xf32>
    %cst_39 = arith.constant -0.867643296 : f32
    %131 = vector.broadcast %cst_39 : f32 to vector<8x128xf32>
    %132 = arith.mulf %131, %120 : vector<8x128xf32>
    %cst_40 = arith.constant 0.0659498572 : f32
    %133 = vector.broadcast %cst_40 : f32 to vector<8x128xf32>
    %134 = arith.addf %133, %132 : vector<8x128xf32>
    %cst_41 = arith.constant -0.00587662589 : f32
    %135 = vector.broadcast %cst_41 : f32 to vector<8x128xf32>
    %136 = arith.mulf %135, %120 : vector<8x128xf32>
    %cst_42 = arith.constant 0.23570323 : f32
    %137 = vector.broadcast %cst_42 : f32 to vector<8x128xf32>
    %138 = arith.addf %137, %136 : vector<8x128xf32>
    %139 = arith.mulf %125, %134 : vector<8x128xf32>
    %140 = arith.addf %130, %139 : vector<8x128xf32>
    %cst_43 = arith.constant 5.14641761E-5 : f32
    %141 = vector.broadcast %cst_43 : f32 to vector<8x128xf32>
    %142 = arith.mulf %125, %141 : vector<8x128xf32>
    %143 = arith.addf %138, %142 : vector<8x128xf32>
    %144 = arith.mulf %126, %143 : vector<8x128xf32>
    %145 = arith.addf %140, %144 : vector<8x128xf32>
    %146 = vector.broadcast %cst : f32 to vector<8x128xf32>
    %147 = arith.mulf %146, %145 : vector<8x128xf32>
    %148 = vector.broadcast %cst_7 : f32 to vector<8x128xf32>
    %149 = arith.mulf %148, %120 : vector<8x128xf32>
    %150 = arith.addf %147, %149 : vector<8x128xf32>
    %151 = vector.broadcast %cst : f32 to vector<8x128xf32>
    %152 = arith.mulf %151, %145 : vector<8x128xf32>
    %153 = vector.broadcast %cst_7 : f32 to vector<8x128xf32>
    %154 = arith.mulf %153, %120 : vector<8x128xf32>
    %155 = arith.subf %152, %154 : vector<8x128xf32>
    %c127_i32_44 = arith.constant 127 : i32
    %156 = tpu.dynamic_rotate %155 by %c127_i32_44 dim 1 : vector<8x128xf32>, i32 -> vector<8x128xf32>
    %157 = arith.addf %150, %156 : vector<8x128xf32>
    %c1_i32_45 = arith.constant 1 : i32
    %158 = tpu.dynamic_rotate %157 by %c1_i32_45 dim 1 : vector<8x128xf32>, i32 -> vector<8x128xf32>
    %159 = arith.subf %157, %158 : vector<8x128xf32>
    %160 = arith.subf %120, %159 : vector<8x128xf32>
    %c127_i32_46 = arith.constant 127 : i32
    %161 = tpu.dynamic_rotate %160 by %c127_i32_46 dim 1 : vector<8x128xf32>, i32 -> vector<8x128xf32>
    %c1_i32_47 = arith.constant 1 : i32
    %162 = tpu.dynamic_rotate %160 by %c1_i32_47 dim 1 : vector<8x128xf32>, i32 -> vector<8x128xf32>
    %163 = vector.shape_cast %21 : vector<1x128xi1> to vector<1x128xi1>
    %164 = vector.broadcast %163 : vector<1x128xi1> to vector<8x128xi1>
    %165 = arith.select %164, %161, %160 : vector<8x128xi1>, vector<8x128xf32>
    %166 = vector.shape_cast %23 : vector<1x128xi1> to vector<1x128xi1>
    %167 = vector.broadcast %166 : vector<1x128xi1> to vector<8x128xi1>
    %168 = arith.select %167, %162, %165 : vector<8x128xi1>, vector<8x128xf32>
    %c3_i32 = arith.constant 3 : i32
    %169 = arith.index_cast %c3_i32 : i32 to index
    %c0_48 = arith.constant 0 : index
    %c0_49 = arith.constant 0 : index
    %170 = vector.load %arg3[%169, %c0_48, %c0_49] : memref<8x8x128xf32, #tpu.memory_space<vmem>>, vector<1x8x128xf32>
    %171 = vector.shape_cast %170 : vector<1x8x128xf32> to vector<8x128xf32>
    %172 = vector.shape_cast %168 : vector<8x128xf32> to vector<1x8x128xf32>
    tpu.vector_store %arg3[%169, %c0_48, %c0_49], %172 {strides = array<i32>} : memref<8x8x128xf32, #tpu.memory_space<vmem>>, vector<1x8x128xf32>,
    %173 = arith.mulf %168, %168 : vector<8x128xf32>
    %174 = arith.mulf %173, %173 : vector<8x128xf32>
    %cst_50 = arith.constant 1.57331407 : f32
    %175 = vector.broadcast %cst_50 : f32 to vector<8x128xf32>
    %176 = arith.mulf %175, %168 : vector<8x128xf32>
    %cst_51 = arith.constant 0.462373435 : f32
    %177 = vector.broadcast %cst_51 : f32 to vector<8x128xf32>
    %178 = arith.addf %177, %176 : vector<8x128xf32>
    %cst_52 = arith.constant -0.867643296 : f32
    %179 = vector.broadcast %cst_52 : f32 to vector<8x128xf32>
    %180 = arith.mulf %179, %168 : vector<8x128xf32>
    %cst_53 = arith.constant 0.0659498572 : f32
    %181 = vector.broadcast %cst_53 : f32 to vector<8x128xf32>
    %182 = arith.addf %181, %180 : vector<8x128xf32>
    %cst_54 = arith.constant -0.00587662589 : f32
    %183 = vector.broadcast %cst_54 : f32 to vector<8x128xf32>
    %184 = arith.mulf %183, %168 : vector<8x128xf32>
    %cst_55 = arith.constant 0.23570323 : f32
    %185 = vector.broadcast %cst_55 : f32 to vector<8x128xf32>
    %186 = arith.addf %185, %184 : vector<8x128xf32>
    %187 = arith.mulf %173, %182 : vector<8x128xf32>
    %188 = arith.addf %178, %187 : vector<8x128xf32>
    %cst_56 = arith.constant 5.14641761E-5 : f32
    %189 = vector.broadcast %cst_56 : f32 to vector<8x128xf32>
    %190 = arith.mulf %173, %189 : vector<8x128xf32>
    %191 = arith.addf %186, %190 : vector<8x128xf32>
    %192 = arith.mulf %174, %191 : vector<8x128xf32>
    %193 = arith.addf %188, %192 : vector<8x128xf32>
    %194 = vector.broadcast %cst : f32 to vector<8x128xf32>
    %195 = arith.mulf %194, %193 : vector<8x128xf32>
    %196 = vector.broadcast %cst_7 : f32 to vector<8x128xf32>
    %197 = arith.mulf %196, %168 : vector<8x128xf32>
    %198 = arith.addf %195, %197 : vector<8x128xf32>
    %199 = vector.broadcast %cst : f32 to vector<8x128xf32>
    %200 = arith.mulf %199, %193 : vector<8x128xf32>
    %201 = vector.broadcast %cst_7 : f32 to vector<8x128xf32>
    %202 = arith.mulf %201, %168 : vector<8x128xf32>
    %203 = arith.subf %200, %202 : vector<8x128xf32>
    %c127_i32_57 = arith.constant 127 : i32
    %204 = tpu.dynamic_rotate %203 by %c127_i32_57 dim 1 : vector<8x128xf32>, i32 -> vector<8x128xf32>
    %205 = arith.addf %198, %204 : vector<8x128xf32>
    %c1_i32_58 = arith.constant 1 : i32
    %206 = tpu.dynamic_rotate %205 by %c1_i32_58 dim 1 : vector<8x128xf32>, i32 -> vector<8x128xf32>
    %207 = arith.subf %205, %206 : vector<8x128xf32>
    %208 = arith.subf %168, %207 : vector<8x128xf32>
    %c127_i32_59 = arith.constant 127 : i32
    %209 = tpu.dynamic_rotate %208 by %c127_i32_59 dim 1 : vector<8x128xf32>, i32 -> vector<8x128xf32>
    %c1_i32_60 = arith.constant 1 : i32
    %210 = tpu.dynamic_rotate %208 by %c1_i32_60 dim 1 : vector<8x128xf32>, i32 -> vector<8x128xf32>
    %211 = vector.shape_cast %21 : vector<1x128xi1> to vector<1x128xi1>
    %212 = vector.broadcast %211 : vector<1x128xi1> to vector<8x128xi1>
    %213 = arith.select %212, %209, %208 : vector<8x128xi1>, vector<8x128xf32>
    %214 = vector.shape_cast %23 : vector<1x128xi1> to vector<1x128xi1>
    %215 = vector.broadcast %214 : vector<1x128xi1> to vector<8x128xi1>
    %216 = arith.select %215, %210, %213 : vector<8x128xi1>, vector<8x128xf32>
    %c4_i32 = arith.constant 4 : i32
    %217 = arith.index_cast %c4_i32 : i32 to index
    %c0_61 = arith.constant 0 : index
    %c0_62 = arith.constant 0 : index
    %218 = vector.load %arg3[%217, %c0_61, %c0_62] : memref<8x8x128xf32, #tpu.memory_space<vmem>>, vector<1x8x128xf32>
    %219 = vector.shape_cast %218 : vector<1x8x128xf32> to vector<8x128xf32>
    %220 = vector.shape_cast %216 : vector<8x128xf32> to vector<1x8x128xf32>
    tpu.vector_store %arg3[%217, %c0_61, %c0_62], %220 {strides = array<i32>} : memref<8x8x128xf32, #tpu.memory_space<vmem>>, vector<1x8x128xf32>,
    %221 = arith.mulf %216, %216 : vector<8x128xf32>
    %222 = arith.mulf %221, %221 : vector<8x128xf32>
    %cst_63 = arith.constant 1.57331407 : f32
    %223 = vector.broadcast %cst_63 : f32 to vector<8x128xf32>
    %224 = arith.mulf %223, %216 : vector<8x128xf32>
    %cst_64 = arith.constant 0.462373435 : f32
    %225 = vector.broadcast %cst_64 : f32 to vector<8x128xf32>
    %226 = arith.addf %225, %224 : vector<8x128xf32>
    %cst_65 = arith.constant -0.867643296 : f32
    %227 = vector.broadcast %cst_65 : f32 to vector<8x128xf32>
    %228 = arith.mulf %227, %216 : vector<8x128xf32>
    %cst_66 = arith.constant 0.0659498572 : f32
    %229 = vector.broadcast %cst_66 : f32 to vector<8x128xf32>
    %230 = arith.addf %229, %228 : vector<8x128xf32>
    %cst_67 = arith.constant -0.00587662589 : f32
    %231 = vector.broadcast %cst_67 : f32 to vector<8x128xf32>
    %232 = arith.mulf %231, %216 : vector<8x128xf32>
    %cst_68 = arith.constant 0.23570323 : f32
    %233 = vector.broadcast %cst_68 : f32 to vector<8x128xf32>
    %234 = arith.addf %233, %232 : vector<8x128xf32>
    %235 = arith.mulf %221, %230 : vector<8x128xf32>
    %236 = arith.addf %226, %235 : vector<8x128xf32>
    %cst_69 = arith.constant 5.14641761E-5 : f32
    %237 = vector.broadcast %cst_69 : f32 to vector<8x128xf32>
    %238 = arith.mulf %221, %237 : vector<8x128xf32>
    %239 = arith.addf %234, %238 : vector<8x128xf32>
    %240 = arith.mulf %222, %239 : vector<8x128xf32>
    %241 = arith.addf %236, %240 : vector<8x128xf32>
    %242 = vector.broadcast %cst : f32 to vector<8x128xf32>
    %243 = arith.mulf %242, %241 : vector<8x128xf32>
    %244 = vector.broadcast %cst_7 : f32 to vector<8x128xf32>
    %245 = arith.mulf %244, %216 : vector<8x128xf32>
    %246 = arith.addf %243, %245 : vector<8x128xf32>
    %247 = vector.broadcast %cst : f32 to vector<8x128xf32>
    %248 = arith.mulf %247, %241 : vector<8x128xf32>
    %249 = vector.broadcast %cst_7 : f32 to vector<8x128xf32>
    %250 = arith.mulf %249, %216 : vector<8x128xf32>
    %251 = arith.subf %248, %250 : vector<8x128xf32>
    %c127_i32_70 = arith.constant 127 : i32
    %252 = tpu.dynamic_rotate %251 by %c127_i32_70 dim 1 : vector<8x128xf32>, i32 -> vector<8x128xf32>
    %253 = arith.addf %246, %252 : vector<8x128xf32>
    %c1_i32_71 = arith.constant 1 : i32
    %254 = tpu.dynamic_rotate %253 by %c1_i32_71 dim 1 : vector<8x128xf32>, i32 -> vector<8x128xf32>
    %255 = arith.subf %253, %254 : vector<8x128xf32>
    %256 = arith.subf %216, %255 : vector<8x128xf32>
    %c127_i32_72 = arith.constant 127 : i32
    %257 = tpu.dynamic_rotate %256 by %c127_i32_72 dim 1 : vector<8x128xf32>, i32 -> vector<8x128xf32>
    %c1_i32_73 = arith.constant 1 : i32
    %258 = tpu.dynamic_rotate %256 by %c1_i32_73 dim 1 : vector<8x128xf32>, i32 -> vector<8x128xf32>
    %259 = vector.shape_cast %21 : vector<1x128xi1> to vector<1x128xi1>
    %260 = vector.broadcast %259 : vector<1x128xi1> to vector<8x128xi1>
    %261 = arith.select %260, %257, %256 : vector<8x128xi1>, vector<8x128xf32>
    %262 = vector.shape_cast %23 : vector<1x128xi1> to vector<1x128xi1>
    %263 = vector.broadcast %262 : vector<1x128xi1> to vector<8x128xi1>
    %264 = arith.select %263, %258, %261 : vector<8x128xi1>, vector<8x128xf32>
    %c5_i32 = arith.constant 5 : i32
    %265 = arith.index_cast %c5_i32 : i32 to index
    %c0_74 = arith.constant 0 : index
    %c0_75 = arith.constant 0 : index
    %266 = vector.load %arg3[%265, %c0_74, %c0_75] : memref<8x8x128xf32, #tpu.memory_space<vmem>>, vector<1x8x128xf32>
    %267 = vector.shape_cast %266 : vector<1x8x128xf32> to vector<8x128xf32>
    %268 = vector.shape_cast %264 : vector<8x128xf32> to vector<1x8x128xf32>
    tpu.vector_store %arg3[%265, %c0_74, %c0_75], %268 {strides = array<i32>} : memref<8x8x128xf32, #tpu.memory_space<vmem>>, vector<1x8x128xf32>,
    %269 = arith.mulf %264, %264 : vector<8x128xf32>
    %270 = arith.mulf %269, %269 : vector<8x128xf32>
    %cst_76 = arith.constant 1.57331407 : f32
    %271 = vector.broadcast %cst_76 : f32 to vector<8x128xf32>
    %272 = arith.mulf %271, %264 : vector<8x128xf32>
    %cst_77 = arith.constant 0.462373435 : f32
    %273 = vector.broadcast %cst_77 : f32 to vector<8x128xf32>
    %274 = arith.addf %273, %272 : vector<8x128xf32>
    %cst_78 = arith.constant -0.867643296 : f32
    %275 = vector.broadcast %cst_78 : f32 to vector<8x128xf32>
    %276 = arith.mulf %275, %264 : vector<8x128xf32>
    %cst_79 = arith.constant 0.0659498572 : f32
    %277 = vector.broadcast %cst_79 : f32 to vector<8x128xf32>
    %278 = arith.addf %277, %276 : vector<8x128xf32>
    %cst_80 = arith.constant -0.00587662589 : f32
    %279 = vector.broadcast %cst_80 : f32 to vector<8x128xf32>
    %280 = arith.mulf %279, %264 : vector<8x128xf32>
    %cst_81 = arith.constant 0.23570323 : f32
    %281 = vector.broadcast %cst_81 : f32 to vector<8x128xf32>
    %282 = arith.addf %281, %280 : vector<8x128xf32>
    %283 = arith.mulf %269, %278 : vector<8x128xf32>
    %284 = arith.addf %274, %283 : vector<8x128xf32>
    %cst_82 = arith.constant 5.14641761E-5 : f32
    %285 = vector.broadcast %cst_82 : f32 to vector<8x128xf32>
    %286 = arith.mulf %269, %285 : vector<8x128xf32>
    %287 = arith.addf %282, %286 : vector<8x128xf32>
    %288 = arith.mulf %270, %287 : vector<8x128xf32>
    %289 = arith.addf %284, %288 : vector<8x128xf32>
    %290 = vector.broadcast %cst : f32 to vector<8x128xf32>
    %291 = arith.mulf %290, %289 : vector<8x128xf32>
    %292 = vector.broadcast %cst_7 : f32 to vector<8x128xf32>
    %293 = arith.mulf %292, %264 : vector<8x128xf32>
    %294 = arith.addf %291, %293 : vector<8x128xf32>
    %295 = vector.broadcast %cst : f32 to vector<8x128xf32>
    %296 = arith.mulf %295, %289 : vector<8x128xf32>
    %297 = vector.broadcast %cst_7 : f32 to vector<8x128xf32>
    %298 = arith.mulf %297, %264 : vector<8x128xf32>
    %299 = arith.subf %296, %298 : vector<8x128xf32>
    %c127_i32_83 = arith.constant 127 : i32
    %300 = tpu.dynamic_rotate %299 by %c127_i32_83 dim 1 : vector<8x128xf32>, i32 -> vector<8x128xf32>
    %301 = arith.addf %294, %300 : vector<8x128xf32>
    %c1_i32_84 = arith.constant 1 : i32
    %302 = tpu.dynamic_rotate %301 by %c1_i32_84 dim 1 : vector<8x128xf32>, i32 -> vector<8x128xf32>
    %303 = arith.subf %301, %302 : vector<8x128xf32>
    %304 = arith.subf %264, %303 : vector<8x128xf32>
    %c127_i32_85 = arith.constant 127 : i32
    %305 = tpu.dynamic_rotate %304 by %c127_i32_85 dim 1 : vector<8x128xf32>, i32 -> vector<8x128xf32>
    %c1_i32_86 = arith.constant 1 : i32
    %306 = tpu.dynamic_rotate %304 by %c1_i32_86 dim 1 : vector<8x128xf32>, i32 -> vector<8x128xf32>
    %307 = vector.shape_cast %21 : vector<1x128xi1> to vector<1x128xi1>
    %308 = vector.broadcast %307 : vector<1x128xi1> to vector<8x128xi1>
    %309 = arith.select %308, %305, %304 : vector<8x128xi1>, vector<8x128xf32>
    %310 = vector.shape_cast %23 : vector<1x128xi1> to vector<1x128xi1>
    %311 = vector.broadcast %310 : vector<1x128xi1> to vector<8x128xi1>
    %312 = arith.select %311, %306, %309 : vector<8x128xi1>, vector<8x128xf32>
    %c6_i32 = arith.constant 6 : i32
    %313 = arith.index_cast %c6_i32 : i32 to index
    %c0_87 = arith.constant 0 : index
    %c0_88 = arith.constant 0 : index
    %314 = vector.load %arg3[%313, %c0_87, %c0_88] : memref<8x8x128xf32, #tpu.memory_space<vmem>>, vector<1x8x128xf32>
    %315 = vector.shape_cast %314 : vector<1x8x128xf32> to vector<8x128xf32>
    %316 = vector.shape_cast %312 : vector<8x128xf32> to vector<1x8x128xf32>
    tpu.vector_store %arg3[%313, %c0_87, %c0_88], %316 {strides = array<i32>} : memref<8x8x128xf32, #tpu.memory_space<vmem>>, vector<1x8x128xf32>,
    %317 = arith.mulf %312, %312 : vector<8x128xf32>
    %318 = arith.mulf %317, %317 : vector<8x128xf32>
    %cst_89 = arith.constant 1.57331407 : f32
    %319 = vector.broadcast %cst_89 : f32 to vector<8x128xf32>
    %320 = arith.mulf %319, %312 : vector<8x128xf32>
    %cst_90 = arith.constant 0.462373435 : f32
    %321 = vector.broadcast %cst_90 : f32 to vector<8x128xf32>
    %322 = arith.addf %321, %320 : vector<8x128xf32>
    %cst_91 = arith.constant -0.867643296 : f32
    %323 = vector.broadcast %cst_91 : f32 to vector<8x128xf32>
    %324 = arith.mulf %323, %312 : vector<8x128xf32>
    %cst_92 = arith.constant 0.0659498572 : f32
    %325 = vector.broadcast %cst_92 : f32 to vector<8x128xf32>
    %326 = arith.addf %325, %324 : vector<8x128xf32>
    %cst_93 = arith.constant -0.00587662589 : f32
    %327 = vector.broadcast %cst_93 : f32 to vector<8x128xf32>
    %328 = arith.mulf %327, %312 : vector<8x128xf32>
    %cst_94 = arith.constant 0.23570323 : f32
    %329 = vector.broadcast %cst_94 : f32 to vector<8x128xf32>
    %330 = arith.addf %329, %328 : vector<8x128xf32>
    %331 = arith.mulf %317, %326 : vector<8x128xf32>
    %332 = arith.addf %322, %331 : vector<8x128xf32>
    %cst_95 = arith.constant 5.14641761E-5 : f32
    %333 = vector.broadcast %cst_95 : f32 to vector<8x128xf32>
    %334 = arith.mulf %317, %333 : vector<8x128xf32>
    %335 = arith.addf %330, %334 : vector<8x128xf32>
    %336 = arith.mulf %318, %335 : vector<8x128xf32>
    %337 = arith.addf %332, %336 : vector<8x128xf32>
    %338 = vector.broadcast %cst : f32 to vector<8x128xf32>
    %339 = arith.mulf %338, %337 : vector<8x128xf32>
    %340 = vector.broadcast %cst_7 : f32 to vector<8x128xf32>
    %341 = arith.mulf %340, %312 : vector<8x128xf32>
    %342 = arith.addf %339, %341 : vector<8x128xf32>
    %343 = vector.broadcast %cst : f32 to vector<8x128xf32>
    %344 = arith.mulf %343, %337 : vector<8x128xf32>
    %345 = vector.broadcast %cst_7 : f32 to vector<8x128xf32>
    %346 = arith.mulf %345, %312 : vector<8x128xf32>
    %347 = arith.subf %344, %346 : vector<8x128xf32>
    %c127_i32_96 = arith.constant 127 : i32
    %348 = tpu.dynamic_rotate %347 by %c127_i32_96 dim 1 : vector<8x128xf32>, i32 -> vector<8x128xf32>
    %349 = arith.addf %342, %348 : vector<8x128xf32>
    %c1_i32_97 = arith.constant 1 : i32
    %350 = tpu.dynamic_rotate %349 by %c1_i32_97 dim 1 : vector<8x128xf32>, i32 -> vector<8x128xf32>
    %351 = arith.subf %349, %350 : vector<8x128xf32>
    %352 = arith.subf %312, %351 : vector<8x128xf32>
    %c127_i32_98 = arith.constant 127 : i32
    %353 = tpu.dynamic_rotate %352 by %c127_i32_98 dim 1 : vector<8x128xf32>, i32 -> vector<8x128xf32>
    %c1_i32_99 = arith.constant 1 : i32
    %354 = tpu.dynamic_rotate %352 by %c1_i32_99 dim 1 : vector<8x128xf32>, i32 -> vector<8x128xf32>
    %355 = vector.shape_cast %21 : vector<1x128xi1> to vector<1x128xi1>
    %356 = vector.broadcast %355 : vector<1x128xi1> to vector<8x128xi1>
    %357 = arith.select %356, %353, %352 : vector<8x128xi1>, vector<8x128xf32>
    %358 = vector.shape_cast %23 : vector<1x128xi1> to vector<1x128xi1>
    %359 = vector.broadcast %358 : vector<1x128xi1> to vector<8x128xi1>
    %360 = arith.select %359, %354, %357 : vector<8x128xi1>, vector<8x128xf32>
    %c7_i32 = arith.constant 7 : i32
    %361 = arith.index_cast %c7_i32 : i32 to index
    %c0_100 = arith.constant 0 : index
    %c0_101 = arith.constant 0 : index
    %362 = vector.load %arg3[%361, %c0_100, %c0_101] : memref<8x8x128xf32, #tpu.memory_space<vmem>>, vector<1x8x128xf32>
    %363 = vector.shape_cast %362 : vector<1x8x128xf32> to vector<8x128xf32>
    %364 = vector.shape_cast %360 : vector<8x128xf32> to vector<1x8x128xf32>
    tpu.vector_store %arg3[%361, %c0_100, %c0_101], %364 {strides = array<i32>} : memref<8x8x128xf32, #tpu.memory_space<vmem>>, vector<1x8x128xf32>,
    %365 = arith.mulf %360, %360 : vector<8x128xf32>
    %366 = arith.mulf %365, %365 : vector<8x128xf32>
    %cst_102 = arith.constant 1.57331407 : f32
    %367 = vector.broadcast %cst_102 : f32 to vector<8x128xf32>
    %368 = arith.mulf %367, %360 : vector<8x128xf32>
    %cst_103 = arith.constant 0.462373435 : f32
    %369 = vector.broadcast %cst_103 : f32 to vector<8x128xf32>
    %370 = arith.addf %369, %368 : vector<8x128xf32>
    %cst_104 = arith.constant -0.867643296 : f32
    %371 = vector.broadcast %cst_104 : f32 to vector<8x128xf32>
    %372 = arith.mulf %371, %360 : vector<8x128xf32>
    %cst_105 = arith.constant 0.0659498572 : f32
    %373 = vector.broadcast %cst_105 : f32 to vector<8x128xf32>
    %374 = arith.addf %373, %372 : vector<8x128xf32>
    %cst_106 = arith.constant -0.00587662589 : f32
    %375 = vector.broadcast %cst_106 : f32 to vector<8x128xf32>
    %376 = arith.mulf %375, %360 : vector<8x128xf32>
    %cst_107 = arith.constant 0.23570323 : f32
    %377 = vector.broadcast %cst_107 : f32 to vector<8x128xf32>
    %378 = arith.addf %377, %376 : vector<8x128xf32>
    %379 = arith.mulf %365, %374 : vector<8x128xf32>
    %380 = arith.addf %370, %379 : vector<8x128xf32>
    %cst_108 = arith.constant 5.14641761E-5 : f32
    %381 = vector.broadcast %cst_108 : f32 to vector<8x128xf32>
    %382 = arith.mulf %365, %381 : vector<8x128xf32>
    %383 = arith.addf %378, %382 : vector<8x128xf32>
    %384 = arith.mulf %366, %383 : vector<8x128xf32>
    %385 = arith.addf %380, %384 : vector<8x128xf32>
    %386 = vector.broadcast %cst : f32 to vector<8x128xf32>
    %387 = arith.mulf %386, %385 : vector<8x128xf32>
    %388 = vector.broadcast %cst_7 : f32 to vector<8x128xf32>
    %389 = arith.mulf %388, %360 : vector<8x128xf32>
    %390 = arith.addf %387, %389 : vector<8x128xf32>
    %391 = vector.broadcast %cst : f32 to vector<8x128xf32>
    %392 = arith.mulf %391, %385 : vector<8x128xf32>
    %393 = vector.broadcast %cst_7 : f32 to vector<8x128xf32>
    %394 = arith.mulf %393, %360 : vector<8x128xf32>
    %395 = arith.subf %392, %394 : vector<8x128xf32>
    %c127_i32_109 = arith.constant 127 : i32
    %396 = tpu.dynamic_rotate %395 by %c127_i32_109 dim 1 : vector<8x128xf32>, i32 -> vector<8x128xf32>
    %397 = arith.addf %390, %396 : vector<8x128xf32>
    %c1_i32_110 = arith.constant 1 : i32
    %398 = tpu.dynamic_rotate %397 by %c1_i32_110 dim 1 : vector<8x128xf32>, i32 -> vector<8x128xf32>
    %399 = arith.subf %397, %398 : vector<8x128xf32>
    %400 = arith.subf %360, %399 : vector<8x128xf32>
    %c127_i32_111 = arith.constant 127 : i32
    %401 = tpu.dynamic_rotate %400 by %c127_i32_111 dim 1 : vector<8x128xf32>, i32 -> vector<8x128xf32>
    %c1_i32_112 = arith.constant 1 : i32
    %402 = tpu.dynamic_rotate %400 by %c1_i32_112 dim 1 : vector<8x128xf32>, i32 -> vector<8x128xf32>
    %403 = vector.shape_cast %21 : vector<1x128xi1> to vector<1x128xi1>
    %404 = vector.broadcast %403 : vector<1x128xi1> to vector<8x128xi1>
    %405 = arith.select %404, %401, %400 : vector<8x128xi1>, vector<8x128xf32>
    %406 = vector.shape_cast %23 : vector<1x128xi1> to vector<1x128xi1>
    %407 = vector.broadcast %406 : vector<1x128xi1> to vector<8x128xi1>
    %408 = arith.select %407, %402, %405 : vector<8x128xi1>, vector<8x128xf32>
    %c8_i32 = arith.constant 8 : i32
    %c0_113 = arith.constant 0 : index
    %c0_114 = arith.constant 0 : index
    %409 = vector.load %arg4[%c0_113, %c0_114] : memref<8x128xf32, #tpu.memory_space<vmem>>, vector<8x128xf32>
    tpu.vector_store %arg4[%c0_113, %c0_114], %408 {strides = array<i32>} : memref<8x128xf32, #tpu.memory_space<vmem>>, vector<8x128xf32>,
    return
  }
  func.func @transform_0(%arg0: i32, %arg1: i32) -> (i32, i32) {
    %c0_i32 = arith.constant 0 : i32
    %c0_i32_0 = arith.constant 0 : i32
    return %arg0, %c0_i32 : i32, i32
  }
  func.func @transform_1(%arg0: i32, %arg1: i32) -> (i32, i32, i32) {
    %c0_i32 = arith.constant 0 : i32
    %c0_i32_0 = arith.constant 0 : i32
    return %arg1, %arg0, %c0_i32 : i32, i32, i32
  }
}

</mosaic_0001>

<bundles_post_ra>
// kernel: tpu_custom_call.1
= control target key start
LH: loop header
LB: loop body
LE: loop exit
PB: predicated region body
PF: predicated region fallthrough
CT: control target
= control target key end

     0   :  { %6 = vsyncpa [#allocation4], 0  ;;  %s487_s0 = inlined_call_operand.hbm [shape: f32[8,128], index: 0, kind: input, shape index: {}]   ;;  %s488_s1 = inlined_call_operand.hbm [shape: f32[8,8,128], index: 1, kind: output, shape index: {}]  }
   0x1   :  { %7 = vsyncpa [#allocation5], 0  ;;  %s383_s6 = smov [#allocation3]   ;;  %s335_s10 = scalar_lea.hbm %s487_s0, 128 }
   0x2   :  { %s14_s7 = sshll.u32 %s383_s6, 4  ;;  %p336_p0 = scmp.ne.s32.totalorder %s487_s0, %s335_s10  ;;  %s15_s7 = int_to_ptr.vmem [resolvable:$true] %s14_s7 }
   0x3   :  { %p339_p1 = scmp.lt.u32.totalorder %s335_s10, %s487_s0 }
   0x5   :  { %p341_p2 = pnand %p339_p1, %p336_p0 }
   0x7   :  { %344 = shalt.err (!%p341_p2)
}
   0x8   :  { %s345_s15 = scalar_lea.vmem %s15_s7, 128  ;;  %p350_p4 = scmp.lt.s32.totalorder %s15_s7, %s15_s7 }
   0x9   :  { %p346_p3 = scmp.ne.s32.totalorder %s15_s7, %s345_s15  ;;  %p351_p5 = scmp.lt.s32.totalorder %s345_s15, %s345_s15 }
   0xb   :  { %p352_p6 = por %p351_p5, %p350_p4 }
   0xd   :  { %p353_p7 = pnand %p352_p6, %p346_p3 }
   0xf   :  { %356 = shalt.err (!%p353_p7)
}
  0x10   :  { %17 = dma.hbm_to_vmem [thread:$0]  %s487_s0, 128, %s15_s7, [#allocation4]  }
  0x11   :  { %379 = dma.done.wait [#allocation4], 128  }
  0x12   :  { %380 = vsyncadd [#allocation4], 4294967168  ;;  %v25_v0 = vld [vmem:[#allocation3] sm:$0xff]  ;;  %s384_s0 = smov 127   ;;  %s385_s18 = smov 1   ;;  %v27_v24 = vlaneseq }
  0x13   :  { %v45_v1 = vmul.f32 %v25_v0, %v25_v0  ;;  %v47_v2 = vmul.f32 1.5733141, %v25_v0  ;;  %v49_v3 = vmul.f32 -0.8676433, %v25_v0  ;;  %v51_v4 = vmul.f32 -0.005876626, %v25_v0 }
  0x14   :  { %44 = vst [vmem:[#allocation6] sm:$0xff] %v25_v0  ;;  %v60_v15 = vmul.f32 0.064, %v25_v0  ;;  %v28_v25 = vand.u32 127, %v27_v24  ;;  %s386_s19 = smov [#allocation6]  }
  0x15   :  { %v48_v5 = vadd.f32 0.46237344, %v47_v2  ;;  %v50_v6 = vadd.f32 0.06594986, %v49_v3  ;;  %v52_v7 = vadd.f32 0.23570323, %v51_v4  ;;  %v46_v8 = vmul.f32 %v45_v1, %v45_v1 }
  0x16   :  { %v55_v9 = vmul.f32 5.1464176e-05, %v45_v1  ;;  %v33_v26 = vand.u32 15, %v28_v25  ;;  %s317_s20 = sshll.u32 %s386_s19, 4  ;;  %s318_s20 = int_to_ptr.vmem [resolvable:$true] %s317_s20 }
  0x17   :  { %v53_v10 = vmul.f32 %v50_v6, %v45_v1  ;;  %s357_s21 = scalar_lea.vmem %s318_s20, 1024  ;;  %p362_p9 = scmp.lt.s32.totalorder %s318_s20, %s318_s20 }
  0x18   :  { %v56_v11 = vadd.f32 %v55_v9, %v52_v7  ;;  %vm415_vm0 = vcmp.eq.s32.totalorder %v33_v26, 0  ;;  %vm419_vm1 = vcmp.eq.s32.totalorder %v33_v26, 15  ;;  %p358_p8 = scmp.ne.s32.totalorder %s318_s20, %s357_s21  ;;  %p363_p10 = scmp.lt.s32.totalorder %s357_s21, %s357_s21 }
  0x19   :  { %v54_v12 = vadd.f32 %v53_v10, %v48_v5 }
  0x1a   :  { %v57_v13 = vmul.f32 %v56_v11, %v46_v8  ;;  %p364_p11 = por %p363_p10, %p362_p9 }
  0x1c   :  { %v58_v14 = vadd.f32 %v57_v13, %v54_v12  ;;  %p365_p12 = pnand %p364_p11, %p358_p8 }
  0x1e   :  { %v59_v16 = vmul.f32 0.04, %v58_v14 }
  0x20   :  { %v62_v17 = vsub.f32 %v59_v16, %v60_v15  ;;  %v61_v18 = vadd.f32 %v60_v15, %v59_v16 }
  0x22   :  { %63 = vrot.lane.b32.xlu0 %v62_v17, %s384_s0 }
  0x94   :  { %v64_v19 = vpop.permute.xlu0 %63 }
  0x95   :  { %v65_v20 = vadd.f32 %v64_v19, %v61_v18 }
  0x97   :  { %66 = vrot.lane.b32.xlu0 %v65_v20, %s385_s18 }
 0x109   :  { %v67_v21 = vpop.permute.xlu0 %66 }
 0x10a   :  { %v68_v22 = vsub.f32 %v65_v20, %v67_v21 }
 0x10c   :  { %v69_v23 = vsub.f32 %v25_v0, %v68_v22 }
 0x10e   :  { %70 = vrot.lane.b32.xlu1 %v69_v23, %s384_s0 }
 0x112   :  { %72 = vrot.lane.b32.xlu1 %v69_v23, %s385_s18 }
 0x180   :  { %v71_v27 = vpop.permute.xlu1 %70 }
 0x181   :  { %v76_v30 = vsel %vm415_vm0, %v71_v27, %v69_v23 }
 0x184   :  { %v73_v31 = vpop.permute.xlu1 %72 }
 0x185   :  { %v79_v32 = vsel %vm419_vm1, %v73_v31, %v76_v30 }
 0x186   :  { %81 = vst [vmem:[#allocation6 + $0x8] sm:$0xff] %v79_v32  ;;  %v82_v33 = vmul.f32 %v79_v32, %v79_v32  ;;  %v84_v34 = vmul.f32 1.5733141, %v79_v32  ;;  %v86_v35 = vmul.f32 -0.8676433, %v79_v32 }
 0x187   :  { %v88_v36 = vmul.f32 -0.005876626, %v79_v32  ;;  %v97_v48 = vmul.f32 0.064, %v79_v32 }
 0x188   :  { %v87_v37 = vadd.f32 0.06594986, %v86_v35  ;;  %v92_v39 = vmul.f32 5.1464176e-05, %v82_v33  ;;  %v85_v40 = vadd.f32 0.46237344, %v84_v34  ;;  %v83_v42 = vmul.f32 %v82_v33, %v82_v33 }
 0x189   :  { %v89_v38 = vadd.f32 0.23570323, %v88_v36 }
 0x18a   :  { %v90_v41 = vmul.f32 %v87_v37, %v82_v33 }
 0x18b   :  { %v93_v43 = vadd.f32 %v92_v39, %v89_v38 }
 0x18c   :  { %v91_v44 = vadd.f32 %v90_v41, %v85_v40 }
 0x18d   :  { %v94_v45 = vmul.f32 %v93_v43, %v83_v42 }
 0x18f   :  { %v95_v46 = vadd.f32 %v94_v45, %v91_v44 }
 0x191   :  { %v96_v47 = vmul.f32 0.04, %v95_v46 }
 0x193   :  { %v99_v49 = vsub.f32 %v96_v47, %v97_v48  ;;  %v98_v50 = vadd.f32 %v97_v48, %v96_v47 }
 0x195   :  { %100 = vrot.lane.b32.xlu0 %v99_v49, %s384_s0 }
 0x207   :  { %v101_v51 = vpop.permute.xlu0 %100 }
 0x208   :  { %v102_v52 = vadd.f32 %v101_v51, %v98_v50 }
 0x20a   :  { %103 = vrot.lane.b32.xlu1 %v102_v52, %s385_s18 }
 0x27c   :  { %v104_v53 = vpop.permute.xlu1 %103 }
 0x27d   :  { %v105_v54 = vsub.f32 %v102_v52, %v104_v53 }
 0x27f   :  { %v106_v55 = vsub.f32 %v79_v32, %v105_v54 }
 0x281   :  { %109 = vrot.lane.b32.xlu1 %v106_v55, %s385_s18  ;;  %107 = vrot.lane.b32.xlu0 %v106_v55, %s384_s0 }
 0x2f3   :  { %v110_v56 = vpop.permute.xlu1 %109  ;;  %v108_v57 = vpop.permute.xlu0 %107 }
 0x2f4   :  { %v111_v58 = vsel %vm415_vm0, %v108_v57, %v106_v55 }
 0x2f5   :  { %v112_v59 = vsel %vm419_vm1, %v110_v56, %v111_v58 }
 0x2f6   :  { %114 = vst [vmem:[#allocation6 + $0x10] sm:$0xff] %v112_v59  ;;  %v115_v60 = vmul.f32 %v112_v59, %v112_v59  ;;  %v117_v61 = vmul.f32 1.5733141, %v112_v59  ;;  %v119_v62 = vmul.f32 -0.8676433, %v112_v59 }
 0x2f7   :  { %v121_v63 = vmul.f32 -0.005876626, %v112_v59  ;;  %v130_v11 = vmul.f32 0.064, %v112_v59 }
 0x2f8   :  { %v120_v0 = vadd.f32 0.06594986, %v119_v62  ;;  %v125_v2 = vmul.f32 5.1464176e-05, %v115_v60  ;;  %v118_v3 = vadd.f32 0.46237344, %v117_v61  ;;  %v116_v5 = vmul.f32 %v115_v60, %v115_v60 }
 0x2f9   :  { %v122_v1 = vadd.f32 0.23570323, %v121_v63 }
 0x2fa   :  { %v123_v4 = vmul.f32 %v120_v0, %v115_v60 }
 0x2fb   :  { %v126_v6 = vadd.f32 %v125_v2, %v122_v1 }
 0x2fc   :  { %v124_v7 = vadd.f32 %v123_v4, %v118_v3 }
 0x2fd   :  { %v127_v8 = vmul.f32 %v126_v6, %v116_v5 }
 0x2ff   :  { %v128_v9 = vadd.f32 %v127_v8, %v124_v7 }
 0x301   :  { %v129_v10 = vmul.f32 0.04, %v128_v9 }
 0x303   :  { %v132_v12 = vsub.f32 %v129_v10, %v130_v11  ;;  %v131_v13 = vadd.f32 %v130_v11, %v129_v10 }
 0x305   :  { %133 = vrot.lane.b32.xlu0 %v132_v12, %s384_s0 }
 0x377   :  { %v134_v14 = vpop.permute.xlu0 %133 }
 0x378   :  { %v135_v15 = vadd.f32 %v134_v14, %v131_v13 }
 0x37a   :  { %136 = vrot.lane.b32.xlu1 %v135_v15, %s385_s18 }
 0x3ec   :  { %v137_v16 = vpop.permute.xlu1 %136 }
 0x3ed   :  { %v138_v17 = vsub.f32 %v135_v15, %v137_v16 }
 0x3ef   :  { %v139_v18 = vsub.f32 %v112_v59, %v138_v17 }
 0x3f1   :  { %142 = vrot.lane.b32.xlu1 %v139_v18, %s385_s18  ;;  %140 = vrot.lane.b32.xlu0 %v139_v18, %s384_s0 }
 0x463   :  { %v143_v19 = vpop.permute.xlu1 %142  ;;  %v141_v20 = vpop.permute.xlu0 %140 }
 0x464   :  { %v144_v21 = vsel %vm415_vm0, %v141_v20, %v139_v18 }
 0x465   :  { %v145_v22 = vsel %vm419_vm1, %v143_v19, %v144_v21 }
 0x466   :  { %147 = vst [vmem:[#allocation6 + $0x18] sm:$0xff] %v145_v22  ;;  %v148_v23 = vmul.f32 %v145_v22, %v145_v22  ;;  %v150_v24 = vmul.f32 1.5733141, %v145_v22  ;;  %v152_v25 = vmul.f32 -0.8676433, %v145_v22 }
 0x467   :  { %v154_v26 = vmul.f32 -0.005876626, %v145_v22  ;;  %v163_v40 = vmul.f32 0.064, %v145_v22 }
 0x468   :  { %v153_v27 = vadd.f32 0.06594986, %v152_v25  ;;  %v158_v31 = vmul.f32 5.1464176e-05, %v148_v23  ;;  %v151_v32 = vadd.f32 0.46237344, %v150_v24  ;;  %v149_v34 = vmul.f32 %v148_v23, %v148_v23 }
 0x469   :  { %v155_v30 = vadd.f32 0.23570323, %v154_v26 }
 0x46a   :  { %v156_v33 = vmul.f32 %v153_v27, %v148_v23 }
 0x46b   :  { %v159_v35 = vadd.f32 %v158_v31, %v155_v30 }
 0x46c   :  { %v157_v36 = vadd.f32 %v156_v33, %v151_v32 }
 0x46d   :  { %v160_v37 = vmul.f32 %v159_v35, %v149_v34 }
 0x46f   :  { %v161_v38 = vadd.f32 %v160_v37, %v157_v36 }
 0x471   :  { %v162_v39 = vmul.f32 0.04, %v161_v38 }
 0x473   :  { %v165_v41 = vsub.f32 %v162_v39, %v163_v40  ;;  %v164_v42 = vadd.f32 %v163_v40, %v162_v39 }
 0x475   :  { %166 = vrot.lane.b32.xlu0 %v165_v41, %s384_s0 }
 0x4e7   :  { %v167_v43 = vpop.permute.xlu0 %166 }
 0x4e8   :  { %v168_v44 = vadd.f32 %v167_v43, %v164_v42 }
 0x4ea   :  { %169 = vrot.lane.b32.xlu1 %v168_v44, %s385_s18 }
 0x55c   :  { %v170_v45 = vpop.permute.xlu1 %169 }
 0x55d   :  { %v171_v46 = vsub.f32 %v168_v44, %v170_v45 }
 0x55f   :  { %v172_v47 = vsub.f32 %v145_v22, %v171_v46 }
 0x561   :  { %175 = vrot.lane.b32.xlu1 %v172_v47, %s385_s18  ;;  %173 = vrot.lane.b32.xlu0 %v172_v47, %s384_s0 }
 0x5d3   :  { %v176_v48 = vpop.permute.xlu1 %175  ;;  %v174_v49 = vpop.permute.xlu0 %173 }
 0x5d4   :  { %v177_v50 = vsel %vm415_vm0, %v174_v49, %v172_v47 }
 0x5d5   :  { %v178_v51 = vsel %vm419_vm1, %v176_v48, %v177_v50 }
 0x5d6   :  { %180 = vst [vmem:[#allocation6 + $0x20] sm:$0xff] %v178_v51  ;;  %v181_v52 = vmul.f32 %v178_v51, %v178_v51  ;;  %v183_v53 = vmul.f32 1.5733141, %v178_v51  ;;  %v185_v54 = vmul.f32 -0.8676433, %v178_v51 }
 0x5d7   :  { %v187_v55 = vmul.f32 -0.005876626, %v178_v51  ;;  %v196_v3 = vmul.f32 0.064, %v178_v51 }
 0x5d8   :  { %v186_v56 = vadd.f32 0.06594986, %v185_v54  ;;  %v191_v58 = vmul.f32 5.1464176e-05, %v181_v52  ;;  %v184_v59 = vadd.f32 0.46237344, %v183_v53  ;;  %v182_v61 = vmul.f32 %v181_v52, %v181_v52 }
 0x5d9   :  { %v188_v57 = vadd.f32 0.23570323, %v187_v55 }
 0x5da   :  { %v189_v60 = vmul.f32 %v186_v56, %v181_v52 }
 0x5db   :  { %v192_v62 = vadd.f32 %v191_v58, %v188_v57 }
 0x5dc   :  { %v190_v63 = vadd.f32 %v189_v60, %v184_v59 }
 0x5dd   :  { %v193_v0 = vmul.f32 %v192_v62, %v182_v61 }
 0x5df   :  { %v194_v1 = vadd.f32 %v193_v0, %v190_v63 }
 0x5e1   :  { %v195_v2 = vmul.f32 0.04, %v194_v1 }
 0x5e3   :  { %v198_v4 = vsub.f32 %v195_v2, %v196_v3  ;;  %v197_v5 = vadd.f32 %v196_v3, %v195_v2 }
 0x5e5   :  { %199 = vrot.lane.b32.xlu0 %v198_v4, %s384_s0 }
 0x657   :  { %v200_v6 = vpop.permute.xlu0 %199 }
 0x658   :  { %v201_v7 = vadd.f32 %v200_v6, %v197_v5 }
 0x65a   :  { %202 = vrot.lane.b32.xlu1 %v201_v7, %s385_s18 }
 0x6cc   :  { %v203_v8 = vpop.permute.xlu1 %202 }
 0x6cd   :  { %v204_v9 = vsub.f32 %v201_v7, %v203_v8 }
 0x6cf   :  { %v205_v10 = vsub.f32 %v178_v51, %v204_v9 }
 0x6d1   :  { %208 = vrot.lane.b32.xlu1 %v205_v10, %s385_s18  ;;  %206 = vrot.lane.b32.xlu0 %v205_v10, %s384_s0 }
 0x743   :  { %v209_v11 = vpop.permute.xlu1 %208  ;;  %v207_v12 = vpop.permute.xlu0 %206 }
 0x744   :  { %v210_v13 = vsel %vm415_vm0, %v207_v12, %v205_v10 }
 0x745   :  { %v211_v14 = vsel %vm419_vm1, %v209_v11, %v210_v13 }
 0x746   :  { %213 = vst [vmem:[#allocation6 + $0x28] sm:$0xff] %v211_v14  ;;  %v214_v15 = vmul.f32 %v211_v14, %v211_v14  ;;  %v216_v16 = vmul.f32 1.5733141, %v211_v14  ;;  %v218_v17 = vmul.f32 -0.8676433, %v211_v14 }
 0x747   :  { %v220_v18 = vmul.f32 -0.005876626, %v211_v14  ;;  %v229_v32 = vmul.f32 0.064, %v211_v14 }
 0x748   :  { %v219_v19 = vadd.f32 0.06594986, %v218_v17  ;;  %v224_v21 = vmul.f32 5.1464176e-05, %v214_v15  ;;  %v217_v22 = vadd.f32 0.46237344, %v216_v16  ;;  %v215_v24 = vmul.f32 %v214_v15, %v214_v15 }
 0x749   :  { %v221_v20 = vadd.f32 0.23570323, %v220_v18 }
 0x74a   :  { %v222_v23 = vmul.f32 %v219_v19, %v214_v15 }
 0x74b   :  { %v225_v25 = vadd.f32 %v224_v21, %v221_v20 }
 0x74c   :  { %v223_v26 = vadd.f32 %v222_v23, %v217_v22 }
 0x74d   :  { %v226_v27 = vmul.f32 %v225_v25, %v215_v24 }
 0x74f   :  { %v227_v30 = vadd.f32 %v226_v27, %v223_v26 }
 0x751   :  { %v228_v31 = vmul.f32 0.04, %v227_v30 }
 0x753   :  { %v231_v33 = vsub.f32 %v228_v31, %v229_v32  ;;  %v230_v34 = vadd.f32 %v229_v32, %v228_v31 }
 0x755   :  { %232 = vrot.lane.b32.xlu0 %v231_v33, %s384_s0 }
 0x7c7   :  { %v233_v35 = vpop.permute.xlu0 %232 }
 0x7c8   :  { %v234_v36 = vadd.f32 %v233_v35, %v230_v34 }
 0x7ca   :  { %235 = vrot.lane.b32.xlu1 %v234_v36, %s385_s18 }
 0x83c   :  { %v236_v37 = vpop.permute.xlu1 %235 }
 0x83d   :  { %v237_v38 = vsub.f32 %v234_v36, %v236_v37 }
 0x83f   :  { %v238_v39 = vsub.f32 %v211_v14, %v237_v38 }
 0x841   :  { %241 = vrot.lane.b32.xlu1 %v238_v39, %s385_s18  ;;  %239 = vrot.lane.b32.xlu0 %v238_v39, %s384_s0 }
 0x8b3   :  { %v242_v40 = vpop.permute.xlu1 %241  ;;  %v240_v41 = vpop.permute.xlu0 %239 }
 0x8b4   :  { %v243_v42 = vsel %vm415_vm0, %v240_v41, %v238_v39 }
 0x8b5   :  { %v244_v43 = vsel %vm419_vm1, %v242_v40, %v243_v42 }
 0x8b6   :  { %246 = vst [vmem:[#allocation6 + $0x30] sm:$0xff] %v244_v43  ;;  %v247_v44 = vmul.f32 %v244_v43, %v244_v43  ;;  %v249_v45 = vmul.f32 1.5733141, %v244_v43  ;;  %v251_v46 = vmul.f32 -0.8676433, %v244_v43 }
 0x8b7   :  { %v253_v47 = vmul.f32 -0.005876626, %v244_v43  ;;  %v262_v59 = vmul.f32 0.064, %v244_v43 }
 0x8b8   :  { %v252_v48 = vadd.f32 0.06594986, %v251_v46  ;;  %v257_v50 = vmul.f32 5.1464176e-05, %v247_v44  ;;  %v250_v51 = vadd.f32 0.46237344, %v249_v45  ;;  %v248_v53 = vmul.f32 %v247_v44, %v247_v44 }
 0x8b9   :  { %v254_v49 = vadd.f32 0.23570323, %v253_v47 }
 0x8ba   :  { %v255_v52 = vmul.f32 %v252_v48, %v247_v44 }
 0x8bb   :  { %v258_v54 = vadd.f32 %v257_v50, %v254_v49 }
 0x8bc   :  { %v256_v55 = vadd.f32 %v255_v52, %v250_v51 }
 0x8bd   :  { %v259_v56 = vmul.f32 %v258_v54, %v248_v53 }
 0x8bf   :  { %v260_v57 = vadd.f32 %v259_v56, %v256_v55 }
 0x8c1   :  { %v261_v58 = vmul.f32 0.04, %v260_v57 }
 0x8c3   :  { %v264_v60 = vsub.f32 %v261_v58, %v262_v59  ;;  %v263_v61 = vadd.f32 %v262_v59, %v261_v58 }
 0x8c5   :  { %265 = vrot.lane.b32.xlu0 %v264_v60, %s384_s0 }
 0x937   :  { %v266_v62 = vpop.permute.xlu0 %265 }
 0x938   :  { %v267_v63 = vadd.f32 %v266_v62, %v263_v61 }
 0x93a   :  { %268 = vrot.lane.b32.xlu1 %v267_v63, %s385_s18 }
 0x9ac   :  { %v269_v0 = vpop.permute.xlu1 %268 }
 0x9ad   :  { %v270_v1 = vsub.f32 %v267_v63, %v269_v0 }
 0x9af   :  { %v271_v2 = vsub.f32 %v244_v43, %v270_v1 }
 0x9b1   :  { %274 = vrot.lane.b32.xlu1 %v271_v2, %s385_s18  ;;  %272 = vrot.lane.b32.xlu0 %v271_v2, %s384_s0 }
 0xa23   :  { %v275_v3 = vpop.permute.xlu1 %274  ;;  %v273_v4 = vpop.permute.xlu0 %272 }
 0xa24   :  { %v276_v5 = vsel %vm415_vm0, %v273_v4, %v271_v2 }
 0xa25   :  { %v277_v6 = vsel %vm419_vm1, %v275_v3, %v276_v5 }
 0xa26   :  { %279 = vst [vmem:[#allocation6 + $0x38] sm:$0xff] %v277_v6 }
 0xa27   :  { %368 = shalt.err (!%p365_p12)
}
 0xa28   :  { %s369_s24 = scalar_lea.hbm %s488_s1, 1024 }
 0xa29   :  { %p370_p13 = scmp.ne.s32.totalorder %s488_s1, %s369_s24  ;;  %p373_p0 = scmp.lt.u32.totalorder %s369_s24, %s488_s1 }
 0xa2b   :  { %p375_p1 = pnand %p373_p0, %p370_p13 }
 0xa2d   :  { %378 = shalt.err (!%p375_p1)
}
 0xa2e   :  { %s387_s29 = smov 128   ;;  %s388_s30 = smov 8  }
 0xa2f   :  { %323 = dma.vmem_to_hbm [thread:$0]  %s318_s20, 1024, %s488_s1, [#allocation5], %s387_s29, %s387_s29, %s388_s30  }
 0xa30   :  { %381 = dma.done.wait [#allocation5], 1024  }
 0xa31   :  { %382 = vsyncadd [#allocation5], 4294966272 }
 0xa32   :  { %327 = vsyncpa [#allocation4], 1 }
 0xa33   :  { %328 = vsyncpa [#allocation5], 1 }

</bundles_post_ra>
